<compile_context>
chip_gen: v7x
topology: tpu7x:2x2x1
jax: 0.10.0
libtpu: 0.0.40
codegen_flags: <defaults>
</compile_context>

<pallas_src>
import functools
import math

import jax
import jax.numpy as jnp
from jax.experimental import pallas as pl
from jax.experimental.pallas import tpu as pltpu


_F32_EPS = float(jnp.finfo(jnp.float32).eps)      # torchmetrics' eps for f32
_TEN_OVER_LN10 = 10.0 / math.log(10.0)


def _upit_loss_kernel(x1_ref, x2_ref, tgt_ref, out_ref, acc_ref, *, inv_t):
    k = pl.program_id(1)

    @pl.when(k == 0)
    def _init():
        acc_ref[...] = jnp.zeros_like(acc_ref)

    x1 = x1_ref[...].astype(jnp.float32)          # (Bt, Tt)
    x2 = x2_ref[...].astype(jnp.float32)          # (Bt, Tt)
    t0 = tgt_ref[:, 0, :].astype(jnp.float32)     # (Bt, Tt) channel 0
    t1 = tgt_ref[:, 1, :].astype(jnp.float32)     # (Bt, Tt) channel 1

    def rsum(v):                                  # reduce over the time tile
        return jnp.sum(v, axis=-1, keepdims=True)  # (Bt, 1)

    partials = (
        rsum(x1), rsum(x2), rsum(t0), rsum(t1),
        rsum(x1 * x1), rsum(x2 * x2), rsum(t0 * t0), rsum(t1 * t1),
        rsum(x1 * t0), rsum(x1 * t1), rsum(x2 * t0), rsum(x2 * t1),
    )
    for j, p in enumerate(partials):
        acc_ref[j] += p

    @pl.when(k == pl.num_programs(1) - 1)
    def _finalize():
        eps = jnp.float32(_F32_EPS)
        inv = jnp.float32(inv_t)
        (sx1, sx2, st0, st1,
         sx1x1, sx2x2, st0t0, st1t1,
         sx1t0, sx1t1, sx2t0, sx2t1) = [acc_ref[j] for j in range(12)]

        def si_snr(sp, st, spp, stt, spt):
            # zero-mean SI-SNR from running moments over the full T axis
            cross = spt - sp * st * inv            # sum((p-mp)*(t-mt))
            tt = stt - st * st * inv               # sum((t-mt)^2)
            pp = spp - sp * sp * inv               # sum((p-mp)^2)
            alpha = (cross + eps) / (tt + eps)
            sig = alpha * alpha * tt               # ||alpha*(t-mt)||^2
            noi = pp - 2.0 * alpha * cross + sig   # ||(p-mp) - alpha*(t-mt)||^2
            return jnp.float32(_TEN_OVER_LN10) * (
                jnp.log(sig + eps) - jnp.log(noi + eps))

        sisnr1 = (si_snr(sx1, st0, sx1x1, st0t0, sx1t0)
                  + si_snr(sx2, st1, sx2x2, st1t1, sx2t1))
        sisnr2 = (si_snr(sx2, st0, sx2x2, st0t0, sx2t0)
                  + si_snr(sx1, st1, sx1x1, st1t1, sx1t1))
        out_ref[...] = -jnp.maximum(sisnr1, sisnr2)   # (Bt, 1) per-batch loss


def _pick_tile(dim, unit, max_tile):
    """Largest multiple of `unit` that divides `dim` and is <= max_tile."""
    t = min(max_tile, dim)
    t -= t % unit
    while t >= unit:
        if dim % t == 0:
            return t
        t -= unit
    return None


def upit_loss(x1, x2, target, *, b_tile=None, t_tile=None):
    """uPIT SI-SNR loss.  x1, x2: (B, T); target: (B, 2, T).  Returns f32 scalar."""
    B, T = x1.shape
    assert x2.shape == (B, T)
    assert target.shape == (B, 2, T)

    if b_tile is None:
        b_tile = _pick_tile(B, 8, 128) or B
    if t_tile is None:
        budget_elems = 256 * 1024                      # per-block element budget
        max_t = max(512, budget_elems // max(b_tile, 1))
        # TODO(synk): very large T that is not a multiple of 128 falls back to a
        # single full-T block; add remainder masking if that case matters.
        t_tile = _pick_tile(T, 128, max_t) or T

    grid = (B // b_tile, T // t_tile)

    x_spec = pl.BlockSpec((b_tile, t_tile), lambda i, k: (i, k))
    tgt_spec = pl.BlockSpec((b_tile, 2, t_tile), lambda i, k: (i, 0, k))
    out_spec = pl.BlockSpec((b_tile, 1), lambda i, k: (i, 0))

    kernel = functools.partial(_upit_loss_kernel, inv_t=1.0 / float(T))

    neg_sisnr = pl.pallas_call(
        kernel,
        out_shape=jax.ShapeDtypeStruct((B, 1), jnp.float32),
        grid=grid,
        in_specs=[x_spec, x_spec, tgt_spec],
        out_specs=out_spec,
        scratch_shapes=[pltpu.VMEM((12, b_tile, 1), jnp.float32)],
        compiler_params=pltpu.CompilerParams(
            dimension_semantics=("parallel", "arbitrary"),
            vmem_limit_bytes=32 * 1024 * 1024,
        ),
    )(x1, x2, target)

    return jnp.mean(neg_sisnr)


# ----------------------------- pure-JAX reference -----------------------------

def _si_snr_ref(preds, target):
    eps = jnp.float32(_F32_EPS)
    preds = preds - jnp.mean(preds, axis=-1, keepdims=True)
    target = target - jnp.mean(target, axis=-1, keepdims=True)
    alpha = (jnp.sum(preds * target, axis=-1, keepdims=True) + eps) / (
        jnp.sum(target * target, axis=-1, keepdims=True) + eps)
    target_scaled = alpha * target
    noise = preds - target_scaled
    val = (jnp.sum(target_scaled * target_scaled, axis=-1) + eps) / (
        jnp.sum(noise * noise, axis=-1) + eps)
    return 10.0 * jnp.log10(val)


def _upit_loss_ref(x1, x2, target):
    x1 = x1.astype(jnp.float32)
    x2 = x2.astype(jnp.float32)
    target = target.astype(jnp.float32)
    p1 = jnp.stack([x1, x2], axis=1)
    p2 = jnp.stack([x2, x1], axis=1)
    sisnr1 = jnp.sum(_si_snr_ref(p1, target), axis=1)
    sisnr2 = jnp.sum(_si_snr_ref(p2, target), axis=1)
    return jnp.mean(-jnp.maximum(sisnr1, sisnr2))


if __name__ == "__main__":
    key = jax.random.PRNGKey(0)

    # Case 1: tiled T axis (exercises the multi-step accumulation path).
    k1, k2, k3, key = jax.random.split(key, 4)
    B, T = 4, 2048
    x1 = jax.random.normal(k1, (B, T), dtype=jnp.float32)
    x2 = jax.random.normal(k2, (B, T), dtype=jnp.float32)
    tgt = jax.random.normal(k3, (B, 2, T), dtype=jnp.float32)

    loss = upit_loss(x1, x2, tgt, t_tile=512)
    jax.block_until_ready(loss)
    ref = _upit_loss_ref(x1, x2, tgt)
    assert jnp.allclose(loss, ref, rtol=1e-3, atol=1e-3), (loss, ref)

    # Case 2: shapes that fall back to full-dim blocks (B not /8, T not /128).
    k4, k5, k6, key = jax.random.split(key, 4)
    B2, T2 = 6, 1000
    y1 = jax.random.normal(k4, (B2, T2), dtype=jnp.float32)
    y2 = jax.random.normal(k5, (B2, T2), dtype=jnp.float32)
    tgt2 = jax.random.normal(k6, (B2, 2, T2), dtype=jnp.float32)

    loss2 = upit_loss(y1, y2, tgt2)
    jax.block_until_ready(loss2)
    ref2 = _upit_loss_ref(y1, y2, tgt2)
    assert jnp.allclose(loss2, ref2, rtol=1e-3, atol=1e-3), (loss2, ref2)

    print("KERNEL_OK")
</pallas_src>

<mosaic_0001>
module attributes {stable_mosaic.version = 11 : i64} {
  func.func @_upit_loss_kernel(%arg0: i32, %arg1: i32, %arg2: memref<4x512xf32, #tpu.memory_space<vmem>>, %arg3: memref<4x512xf32, #tpu.memory_space<vmem>>, %arg4: memref<4x2x512xf32, #tpu.memory_space<vmem>>, %arg5: memref<4x1xf32, #tpu.memory_space<vmem>>, %arg6: memref<12x4x1xf32, #tpu.memory_space<vmem>>) attributes {dimension_semantics = [#tpu.dimension_semantics<parallel>, #tpu.dimension_semantics<arbitrary>], iteration_bounds = array<i64: 1, 4>, scalar_prefetch = 0 : i64, scratch_operands = 1 : i64, tpu.core_type = #tpu.core_type<tc>, window_params = [{transform_indices = @transform_0, window_bounds = array<i64: 4, 512>}, {transform_indices = @transform_1, window_bounds = array<i64: 4, 512>}, {transform_indices = @transform_2, window_bounds = array<i64: 4, 2, 512>}, {transform_indices = @transform_3, window_bounds = array<i64: 4, 1>}]} {
    %c0_i32 = arith.constant 0 : i32
    %0 = arith.cmpi eq, %arg1, %c0_i32 : i32
    %1 = arith.extui %0 : i1 to i32
    %c0_i32_0 = arith.constant 0 : i32
    %2 = arith.cmpi ne, %1, %c0_i32_0 : i32
    scf.if %2 {
      %cst_83 = arith.constant 0.000000e+00 : f32
      %116 = vector.broadcast %cst_83 : f32 to vector<12x4x1xf32>
      %c0_84 = arith.constant 0 : index
      %c0_85 = arith.constant 0 : index
      %c0_86 = arith.constant 0 : index
      %117 = vector.load %arg6[%c0_84, %c0_85, %c0_86] : memref<12x4x1xf32, #tpu.memory_space<vmem>>, vector<12x4x1xf32>
      tpu.vector_store %arg6[%c0_84, %c0_85, %c0_86], %116 {strides = array<i32>} : memref<12x4x1xf32, #tpu.memory_space<vmem>>, vector<12x4x1xf32>,
    } else {
    }
    %c0 = arith.constant 0 : index
    %c0_1 = arith.constant 0 : index
    %3 = vector.load %arg2[%c0, %c0_1] : memref<4x512xf32, #tpu.memory_space<vmem>>, vector<4x512xf32>
    %c0_2 = arith.constant 0 : index
    %c0_3 = arith.constant 0 : index
    %4 = vector.load %arg3[%c0_2, %c0_3] : memref<4x512xf32, #tpu.memory_space<vmem>>, vector<4x512xf32>
    %c0_4 = arith.constant 0 : index
    %c0_5 = arith.constant 0 : index
    %c0_6 = arith.constant 0 : index
    %5 = vector.load %arg4[%c0_4, %c0_5, %c0_6] : memref<4x2x512xf32, #tpu.memory_space<vmem>>, vector<4x1x512xf32>
    %6 = vector.shape_cast %5 : vector<4x1x512xf32> to vector<4x512xf32>
    %c0_7 = arith.constant 0 : index
    %c1 = arith.constant 1 : index
    %c0_8 = arith.constant 0 : index
    %7 = vector.load %arg4[%c0_7, %c1, %c0_8] : memref<4x2x512xf32, #tpu.memory_space<vmem>>, vector<4x1x512xf32>
    %8 = vector.shape_cast %7 : vector<4x1x512xf32> to vector<4x512xf32>
    %cst = arith.constant dense<0.000000e+00> : vector<4xf32>
    %9 = vector.multi_reduction <add>, %3, %cst [1] : vector<4x512xf32> to vector<4xf32>
    %10 = vector.shape_cast %9 : vector<4xf32> to vector<4x1xf32>
    %cst_9 = arith.constant dense<0.000000e+00> : vector<4xf32>
    %11 = vector.multi_reduction <add>, %4, %cst_9 [1] : vector<4x512xf32> to vector<4xf32>
    %12 = vector.shape_cast %11 : vector<4xf32> to vector<4x1xf32>
    %cst_10 = arith.constant dense<0.000000e+00> : vector<4xf32>
    %13 = vector.multi_reduction <add>, %6, %cst_10 [1] : vector<4x512xf32> to vector<4xf32>
    %14 = vector.shape_cast %13 : vector<4xf32> to vector<4x1xf32>
    %cst_11 = arith.constant dense<0.000000e+00> : vector<4xf32>
    %15 = vector.multi_reduction <add>, %8, %cst_11 [1] : vector<4x512xf32> to vector<4xf32>
    %16 = vector.shape_cast %15 : vector<4xf32> to vector<4x1xf32>
    %17 = arith.mulf %3, %3 : vector<4x512xf32>
    %cst_12 = arith.constant dense<0.000000e+00> : vector<4xf32>
    %18 = vector.multi_reduction <add>, %17, %cst_12 [1] : vector<4x512xf32> to vector<4xf32>
    %19 = vector.shape_cast %18 : vector<4xf32> to vector<4x1xf32>
    %20 = arith.mulf %4, %4 : vector<4x512xf32>
    %cst_13 = arith.constant dense<0.000000e+00> : vector<4xf32>
    %21 = vector.multi_reduction <add>, %20, %cst_13 [1] : vector<4x512xf32> to vector<4xf32>
    %22 = vector.shape_cast %21 : vector<4xf32> to vector<4x1xf32>
    %23 = arith.mulf %6, %6 : vector<4x512xf32>
    %cst_14 = arith.constant dense<0.000000e+00> : vector<4xf32>
    %24 = vector.multi_reduction <add>, %23, %cst_14 [1] : vector<4x512xf32> to vector<4xf32>
    %25 = vector.shape_cast %24 : vector<4xf32> to vector<4x1xf32>
    %26 = arith.mulf %8, %8 : vector<4x512xf32>
    %cst_15 = arith.constant dense<0.000000e+00> : vector<4xf32>
    %27 = vector.multi_reduction <add>, %26, %cst_15 [1] : vector<4x512xf32> to vector<4xf32>
    %28 = vector.shape_cast %27 : vector<4xf32> to vector<4x1xf32>
    %29 = arith.mulf %3, %6 : vector<4x512xf32>
    %cst_16 = arith.constant dense<0.000000e+00> : vector<4xf32>
    %30 = vector.multi_reduction <add>, %29, %cst_16 [1] : vector<4x512xf32> to vector<4xf32>
    %31 = vector.shape_cast %30 : vector<4xf32> to vector<4x1xf32>
    %32 = arith.mulf %3, %8 : vector<4x512xf32>
    %cst_17 = arith.constant dense<0.000000e+00> : vector<4xf32>
    %33 = vector.multi_reduction <add>, %32, %cst_17 [1] : vector<4x512xf32> to vector<4xf32>
    %34 = vector.shape_cast %33 : vector<4xf32> to vector<4x1xf32>
    %35 = arith.mulf %4, %6 : vector<4x512xf32>
    %cst_18 = arith.constant dense<0.000000e+00> : vector<4xf32>
    %36 = vector.multi_reduction <add>, %35, %cst_18 [1] : vector<4x512xf32> to vector<4xf32>
    %37 = vector.shape_cast %36 : vector<4xf32> to vector<4x1xf32>
    %38 = arith.mulf %4, %8 : vector<4x512xf32>
    %cst_19 = arith.constant dense<0.000000e+00> : vector<4xf32>
    %39 = vector.multi_reduction <add>, %38, %cst_19 [1] : vector<4x512xf32> to vector<4xf32>
    %40 = vector.shape_cast %39 : vector<4xf32> to vector<4x1xf32>
    %c0_20 = arith.constant 0 : index
    %c0_21 = arith.constant 0 : index
    %c0_22 = arith.constant 0 : index
    %41 = vector.load %arg6[%c0_20, %c0_21, %c0_22] : memref<12x4x1xf32, #tpu.memory_space<vmem>>, vector<1x4x1xf32>
    %42 = vector.shape_cast %41 : vector<1x4x1xf32> to vector<4x1xf32>
    %43 = arith.addf %42, %10 : vector<4x1xf32>
    %c0_23 = arith.constant 0 : index
    %c0_24 = arith.constant 0 : index
    %c0_25 = arith.constant 0 : index
    %44 = vector.load %arg6[%c0_23, %c0_24, %c0_25] : memref<12x4x1xf32, #tpu.memory_space<vmem>>, vector<1x4x1xf32>
    %45 = vector.shape_cast %44 : vector<1x4x1xf32> to vector<4x1xf32>
    %46 = vector.shape_cast %43 : vector<4x1xf32> to vector<1x4x1xf32>
    tpu.vector_store %arg6[%c0_23, %c0_24, %c0_25], %46 {strides = array<i32>} : memref<12x4x1xf32, #tpu.memory_space<vmem>>, vector<1x4x1xf32>,
    %c1_26 = arith.constant 1 : index
    %c0_27 = arith.constant 0 : index
    %c0_28 = arith.constant 0 : index
    %47 = vector.load %arg6[%c1_26, %c0_27, %c0_28] : memref<12x4x1xf32, #tpu.memory_space<vmem>>, vector<1x4x1xf32>
    %48 = vector.shape_cast %47 : vector<1x4x1xf32> to vector<4x1xf32>
    %49 = arith.addf %48, %12 : vector<4x1xf32>
    %c1_29 = arith.constant 1 : index
    %c0_30 = arith.constant 0 : index
    %c0_31 = arith.constant 0 : index
    %50 = vector.load %arg6[%c1_29, %c0_30, %c0_31] : memref<12x4x1xf32, #tpu.memory_space<vmem>>, vector<1x4x1xf32>
    %51 = vector.shape_cast %50 : vector<1x4x1xf32> to vector<4x1xf32>
    %52 = vector.shape_cast %49 : vector<4x1xf32> to vector<1x4x1xf32>
    tpu.vector_store %arg6[%c1_29, %c0_30, %c0_31], %52 {strides = array<i32>} : memref<12x4x1xf32, #tpu.memory_space<vmem>>, vector<1x4x1xf32>,
    %c2 = arith.constant 2 : index
    %c0_32 = arith.constant 0 : index
    %c0_33 = arith.constant 0 : index
    %53 = vector.load %arg6[%c2, %c0_32, %c0_33] : memref<12x4x1xf32, #tpu.memory_space<vmem>>, vector<1x4x1xf32>
    %54 = vector.shape_cast %53 : vector<1x4x1xf32> to vector<4x1xf32>
    %55 = arith.addf %54, %14 : vector<4x1xf32>
    %c2_34 = arith.constant 2 : index
    %c0_35 = arith.constant 0 : index
    %c0_36 = arith.constant 0 : index
    %56 = vector.load %arg6[%c2_34, %c0_35, %c0_36] : memref<12x4x1xf32, #tpu.memory_space<vmem>>, vector<1x4x1xf32>
    %57 = vector.shape_cast %56 : vector<1x4x1xf32> to vector<4x1xf32>
    %58 = vector.shape_cast %55 : vector<4x1xf32> to vector<1x4x1xf32>
    tpu.vector_store %arg6[%c2_34, %c0_35, %c0_36], %58 {strides = array<i32>} : memref<12x4x1xf32, #tpu.memory_space<vmem>>, vector<1x4x1xf32>,
    %c3 = arith.constant 3 : index
    %c0_37 = arith.constant 0 : index
    %c0_38 = arith.constant 0 : index
    %59 = vector.load %arg6[%c3, %c0_37, %c0_38] : memref<12x4x1xf32, #tpu.memory_space<vmem>>, vector<1x4x1xf32>
    %60 = vector.shape_cast %59 : vector<1x4x1xf32> to vector<4x1xf32>
    %61 = arith.addf %60, %16 : vector<4x1xf32>
    %c3_39 = arith.constant 3 : index
    %c0_40 = arith.constant 0 : index
    %c0_41 = arith.constant 0 : index
    %62 = vector.load %arg6[%c3_39, %c0_40, %c0_41] : memref<12x4x1xf32, #tpu.memory_space<vmem>>, vector<1x4x1xf32>
    %63 = vector.shape_cast %62 : vector<1x4x1xf32> to vector<4x1xf32>
    %64 = vector.shape_cast %61 : vector<4x1xf32> to vector<1x4x1xf32>
    tpu.vector_store %arg6[%c3_39, %c0_40, %c0_41], %64 {strides = array<i32>} : memref<12x4x1xf32, #tpu.memory_space<vmem>>, vector<1x4x1xf32>,
    %c4 = arith.constant 4 : index
    %c0_42 = arith.constant 0 : index
    %c0_43 = arith.constant 0 : index
    %65 = vector.load %arg6[%c4, %c0_42, %c0_43] : memref<12x4x1xf32, #tpu.memory_space<vmem>>, vector<1x4x1xf32>
    %66 = vector.shape_cast %65 : vector<1x4x1xf32> to vector<4x1xf32>
    %67 = arith.addf %66, %19 : vector<4x1xf32>
    %c4_44 = arith.constant 4 : index
    %c0_45 = arith.constant 0 : index
    %c0_46 = arith.constant 0 : index
    %68 = vector.load %arg6[%c4_44, %c0_45, %c0_46] : memref<12x4x1xf32, #tpu.memory_space<vmem>>, vector<1x4x1xf32>
    %69 = vector.shape_cast %68 : vector<1x4x1xf32> to vector<4x1xf32>
    %70 = vector.shape_cast %67 : vector<4x1xf32> to vector<1x4x1xf32>
    tpu.vector_store %arg6[%c4_44, %c0_45, %c0_46], %70 {strides = array<i32>} : memref<12x4x1xf32, #tpu.memory_space<vmem>>, vector<1x4x1xf32>,
    %c5 = arith.constant 5 : index
    %c0_47 = arith.constant 0 : index
    %c0_48 = arith.constant 0 : index
    %71 = vector.load %arg6[%c5, %c0_47, %c0_48] : memref<12x4x1xf32, #tpu.memory_space<vmem>>, vector<1x4x1xf32>
    %72 = vector.shape_cast %71 : vector<1x4x1xf32> to vector<4x1xf32>
    %73 = arith.addf %72, %22 : vector<4x1xf32>
    %c5_49 = arith.constant 5 : index
    %c0_50 = arith.constant 0 : index
    %c0_51 = arith.constant 0 : index
    %74 = vector.load %arg6[%c5_49, %c0_50, %c0_51] : memref<12x4x1xf32, #tpu.memory_space<vmem>>, vector<1x4x1xf32>
    %75 = vector.shape_cast %74 : vector<1x4x1xf32> to vector<4x1xf32>
    %76 = vector.shape_cast %73 : vector<4x1xf32> to vector<1x4x1xf32>
    tpu.vector_store %arg6[%c5_49, %c0_50, %c0_51], %76 {strides = array<i32>} : memref<12x4x1xf32, #tpu.memory_space<vmem>>, vector<1x4x1xf32>,
    %c6 = arith.constant 6 : index
    %c0_52 = arith.constant 0 : index
    %c0_53 = arith.constant 0 : index
    %77 = vector.load %arg6[%c6, %c0_52, %c0_53] : memref<12x4x1xf32, #tpu.memory_space<vmem>>, vector<1x4x1xf32>
    %78 = vector.shape_cast %77 : vector<1x4x1xf32> to vector<4x1xf32>
    %79 = arith.addf %78, %25 : vector<4x1xf32>
    %c6_54 = arith.constant 6 : index
    %c0_55 = arith.constant 0 : index
    %c0_56 = arith.constant 0 : index
    %80 = vector.load %arg6[%c6_54, %c0_55, %c0_56] : memref<12x4x1xf32, #tpu.memory_space<vmem>>, vector<1x4x1xf32>
    %81 = vector.shape_cast %80 : vector<1x4x1xf32> to vector<4x1xf32>
    %82 = vector.shape_cast %79 : vector<4x1xf32> to vector<1x4x1xf32>
    tpu.vector_store %arg6[%c6_54, %c0_55, %c0_56], %82 {strides = array<i32>} : memref<12x4x1xf32, #tpu.memory_space<vmem>>, vector<1x4x1xf32>,
    %c7 = arith.constant 7 : index
    %c0_57 = arith.constant 0 : index
    %c0_58 = arith.constant 0 : index
    %83 = vector.load %arg6[%c7, %c0_57, %c0_58] : memref<12x4x1xf32, #tpu.memory_space<vmem>>, vector<1x4x1xf32>
    %84 = vector.shape_cast %83 : vector<1x4x1xf32> to vector<4x1xf32>
    %85 = arith.addf %84, %28 : vector<4x1xf32>
    %c7_59 = arith.constant 7 : index
    %c0_60 = arith.constant 0 : index
    %c0_61 = arith.constant 0 : index
    %86 = vector.load %arg6[%c7_59, %c0_60, %c0_61] : memref<12x4x1xf32, #tpu.memory_space<vmem>>, vector<1x4x1xf32>
    %87 = vector.shape_cast %86 : vector<1x4x1xf32> to vector<4x1xf32>
    %88 = vector.shape_cast %85 : vector<4x1xf32> to vector<1x4x1xf32>
    tpu.vector_store %arg6[%c7_59, %c0_60, %c0_61], %88 {strides = array<i32>} : memref<12x4x1xf32, #tpu.memory_space<vmem>>, vector<1x4x1xf32>,
    %c8 = arith.constant 8 : index
    %c0_62 = arith.constant 0 : index
    %c0_63 = arith.constant 0 : index
    %89 = vector.load %arg6[%c8, %c0_62, %c0_63] : memref<12x4x1xf32, #tpu.memory_space<vmem>>, vector<1x4x1xf32>
    %90 = vector.shape_cast %89 : vector<1x4x1xf32> to vector<4x1xf32>
    %91 = arith.addf %90, %31 : vector<4x1xf32>
    %c8_64 = arith.constant 8 : index
    %c0_65 = arith.constant 0 : index
    %c0_66 = arith.constant 0 : index
    %92 = vector.load %arg6[%c8_64, %c0_65, %c0_66] : memref<12x4x1xf32, #tpu.memory_space<vmem>>, vector<1x4x1xf32>
    %93 = vector.shape_cast %92 : vector<1x4x1xf32> to vector<4x1xf32>
    %94 = vector.shape_cast %91 : vector<4x1xf32> to vector<1x4x1xf32>
    tpu.vector_store %arg6[%c8_64, %c0_65, %c0_66], %94 {strides = array<i32>} : memref<12x4x1xf32, #tpu.memory_space<vmem>>, vector<1x4x1xf32>,
    %c9 = arith.constant 9 : index
    %c0_67 = arith.constant 0 : index
    %c0_68 = arith.constant 0 : index
    %95 = vector.load %arg6[%c9, %c0_67, %c0_68] : memref<12x4x1xf32, #tpu.memory_space<vmem>>, vector<1x4x1xf32>
    %96 = vector.shape_cast %95 : vector<1x4x1xf32> to vector<4x1xf32>
    %97 = arith.addf %96, %34 : vector<4x1xf32>
    %c9_69 = arith.constant 9 : index
    %c0_70 = arith.constant 0 : index
    %c0_71 = arith.constant 0 : index
    %98 = vector.load %arg6[%c9_69, %c0_70, %c0_71] : memref<12x4x1xf32, #tpu.memory_space<vmem>>, vector<1x4x1xf32>
    %99 = vector.shape_cast %98 : vector<1x4x1xf32> to vector<4x1xf32>
    %100 = vector.shape_cast %97 : vector<4x1xf32> to vector<1x4x1xf32>
    tpu.vector_store %arg6[%c9_69, %c0_70, %c0_71], %100 {strides = array<i32>} : memref<12x4x1xf32, #tpu.memory_space<vmem>>, vector<1x4x1xf32>,
    %c10 = arith.constant 10 : index
    %c0_72 = arith.constant 0 : index
    %c0_73 = arith.constant 0 : index
    %101 = vector.load %arg6[%c10, %c0_72, %c0_73] : memref<12x4x1xf32, #tpu.memory_space<vmem>>, vector<1x4x1xf32>
    %102 = vector.shape_cast %101 : vector<1x4x1xf32> to vector<4x1xf32>
    %103 = arith.addf %102, %37 : vector<4x1xf32>
    %c10_74 = arith.constant 10 : index
    %c0_75 = arith.constant 0 : index
    %c0_76 = arith.constant 0 : index
    %104 = vector.load %arg6[%c10_74, %c0_75, %c0_76] : memref<12x4x1xf32, #tpu.memory_space<vmem>>, vector<1x4x1xf32>
    %105 = vector.shape_cast %104 : vector<1x4x1xf32> to vector<4x1xf32>
    %106 = vector.shape_cast %103 : vector<4x1xf32> to vector<1x4x1xf32>
    tpu.vector_store %arg6[%c10_74, %c0_75, %c0_76], %106 {strides = array<i32>} : memref<12x4x1xf32, #tpu.memory_space<vmem>>, vector<1x4x1xf32>,
    %c11 = arith.constant 11 : index
    %c0_77 = arith.constant 0 : index
    %c0_78 = arith.constant 0 : index
    %107 = vector.load %arg6[%c11, %c0_77, %c0_78] : memref<12x4x1xf32, #tpu.memory_space<vmem>>, vector<1x4x1xf32>
    %108 = vector.shape_cast %107 : vector<1x4x1xf32> to vector<4x1xf32>
    %109 = arith.addf %108, %40 : vector<4x1xf32>
    %c11_79 = arith.constant 11 : index
    %c0_80 = arith.constant 0 : index
    %c0_81 = arith.constant 0 : index
    %110 = vector.load %arg6[%c11_79, %c0_80, %c0_81] : memref<12x4x1xf32, #tpu.memory_space<vmem>>, vector<1x4x1xf32>
    %111 = vector.shape_cast %110 : vector<1x4x1xf32> to vector<4x1xf32>
    %112 = vector.shape_cast %109 : vector<4x1xf32> to vector<1x4x1xf32>
    tpu.vector_store %arg6[%c11_79, %c0_80, %c0_81], %112 {strides = array<i32>} : memref<12x4x1xf32, #tpu.memory_space<vmem>>, vector<1x4x1xf32>,
    %c3_i32 = arith.constant 3 : i32
    %113 = arith.cmpi eq, %arg1, %c3_i32 : i32
    %114 = arith.extui %113 : i1 to i32
    %c0_i32_82 = arith.constant 0 : i32
    %115 = arith.cmpi ne, %114, %c0_i32_82 : i32
    scf.if %115 {
      %c0_83 = arith.constant 0 : index
      %c0_84 = arith.constant 0 : index
      %c0_85 = arith.constant 0 : index
      %116 = vector.load %arg6[%c0_83, %c0_84, %c0_85] : memref<12x4x1xf32, #tpu.memory_space<vmem>>, vector<1x4x1xf32>
      %117 = vector.shape_cast %116 : vector<1x4x1xf32> to vector<4x1xf32>
      %c1_86 = arith.constant 1 : index
      %c0_87 = arith.constant 0 : index
      %c0_88 = arith.constant 0 : index
      %118 = vector.load %arg6[%c1_86, %c0_87, %c0_88] : memref<12x4x1xf32, #tpu.memory_space<vmem>>, vector<1x4x1xf32>
      %119 = vector.shape_cast %118 : vector<1x4x1xf32> to vector<4x1xf32>
      %c2_89 = arith.constant 2 : index
      %c0_90 = arith.constant 0 : index
      %c0_91 = arith.constant 0 : index
      %120 = vector.load %arg6[%c2_89, %c0_90, %c0_91] : memref<12x4x1xf32, #tpu.memory_space<vmem>>, vector<1x4x1xf32>
      %121 = vector.shape_cast %120 : vector<1x4x1xf32> to vector<4x1xf32>
      %c3_92 = arith.constant 3 : index
      %c0_93 = arith.constant 0 : index
      %c0_94 = arith.constant 0 : index
      %122 = vector.load %arg6[%c3_92, %c0_93, %c0_94] : memref<12x4x1xf32, #tpu.memory_space<vmem>>, vector<1x4x1xf32>
      %123 = vector.shape_cast %122 : vector<1x4x1xf32> to vector<4x1xf32>
      %c4_95 = arith.constant 4 : index
      %c0_96 = arith.constant 0 : index
      %c0_97 = arith.constant 0 : index
      %124 = vector.load %arg6[%c4_95, %c0_96, %c0_97] : memref<12x4x1xf32, #tpu.memory_space<vmem>>, vector<1x4x1xf32>
      %125 = vector.shape_cast %124 : vector<1x4x1xf32> to vector<4x1xf32>
      %c5_98 = arith.constant 5 : index
      %c0_99 = arith.constant 0 : index
      %c0_100 = arith.constant 0 : index
      %126 = vector.load %arg6[%c5_98, %c0_99, %c0_100] : memref<12x4x1xf32, #tpu.memory_space<vmem>>, vector<1x4x1xf32>
      %127 = vector.shape_cast %126 : vector<1x4x1xf32> to vector<4x1xf32>
      %c6_101 = arith.constant 6 : index
      %c0_102 = arith.constant 0 : index
      %c0_103 = arith.constant 0 : index
      %128 = vector.load %arg6[%c6_101, %c0_102, %c0_103] : memref<12x4x1xf32, #tpu.memory_space<vmem>>, vector<1x4x1xf32>
      %129 = vector.shape_cast %128 : vector<1x4x1xf32> to vector<4x1xf32>
      %c7_104 = arith.constant 7 : index
      %c0_105 = arith.constant 0 : index
      %c0_106 = arith.constant 0 : index
      %130 = vector.load %arg6[%c7_104, %c0_105, %c0_106] : memref<12x4x1xf32, #tpu.memory_space<vmem>>, vector<1x4x1xf32>
      %131 = vector.shape_cast %130 : vector<1x4x1xf32> to vector<4x1xf32>
      %c8_107 = arith.constant 8 : index
      %c0_108 = arith.constant 0 : index
      %c0_109 = arith.constant 0 : index
      %132 = vector.load %arg6[%c8_107, %c0_108, %c0_109] : memref<12x4x1xf32, #tpu.memory_space<vmem>>, vector<1x4x1xf32>
      %133 = vector.shape_cast %132 : vector<1x4x1xf32> to vector<4x1xf32>
      %c9_110 = arith.constant 9 : index
      %c0_111 = arith.constant 0 : index
      %c0_112 = arith.constant 0 : index
      %134 = vector.load %arg6[%c9_110, %c0_111, %c0_112] : memref<12x4x1xf32, #tpu.memory_space<vmem>>, vector<1x4x1xf32>
      %135 = vector.shape_cast %134 : vector<1x4x1xf32> to vector<4x1xf32>
      %c10_113 = arith.constant 10 : index
      %c0_114 = arith.constant 0 : index
      %c0_115 = arith.constant 0 : index
      %136 = vector.load %arg6[%c10_113, %c0_114, %c0_115] : memref<12x4x1xf32, #tpu.memory_space<vmem>>, vector<1x4x1xf32>
      %137 = vector.shape_cast %136 : vector<1x4x1xf32> to vector<4x1xf32>
      %c11_116 = arith.constant 11 : index
      %c0_117 = arith.constant 0 : index
      %c0_118 = arith.constant 0 : index
      %138 = vector.load %arg6[%c11_116, %c0_117, %c0_118] : memref<12x4x1xf32, #tpu.memory_space<vmem>>, vector<1x4x1xf32>
      %139 = vector.shape_cast %138 : vector<1x4x1xf32> to vector<4x1xf32>
      %140 = arith.mulf %117, %121 : vector<4x1xf32>
      %cst_119 = arith.constant 4.8828125E-4 : f32
      %141 = vector.broadcast %cst_119 : f32 to vector<4x1xf32>
      %142 = arith.mulf %140, %141 : vector<4x1xf32>
      %143 = arith.subf %133, %142 : vector<4x1xf32>
      %144 = arith.mulf %121, %121 : vector<4x1xf32>
      %cst_120 = arith.constant 4.8828125E-4 : f32
      %145 = vector.broadcast %cst_120 : f32 to vector<4x1xf32>
      %146 = arith.mulf %144, %145 : vector<4x1xf32>
      %147 = arith.subf %129, %146 : vector<4x1xf32>
      %148 = arith.mulf %117, %117 : vector<4x1xf32>
      %cst_121 = arith.constant 4.8828125E-4 : f32
      %149 = vector.broadcast %cst_121 : f32 to vector<4x1xf32>
      %150 = arith.mulf %148, %149 : vector<4x1xf32>
      %151 = arith.subf %125, %150 : vector<4x1xf32>
      %cst_122 = arith.constant 1.1920929E-7 : f32
      %152 = vector.broadcast %cst_122 : f32 to vector<4x1xf32>
      %153 = arith.addf %143, %152 : vector<4x1xf32>
      %cst_123 = arith.constant 1.1920929E-7 : f32
      %154 = vector.broadcast %cst_123 : f32 to vector<4x1xf32>
      %155 = arith.addf %147, %154 : vector<4x1xf32>
      %156 = arith.divf %153, %155 : vector<4x1xf32>
      %157 = arith.mulf %156, %156 : vector<4x1xf32>
      %158 = arith.mulf %157, %147 : vector<4x1xf32>
      %cst_124 = arith.constant 2.000000e+00 : f32
      %159 = vector.broadcast %cst_124 : f32 to vector<4x1xf32>
      %160 = arith.mulf %159, %156 : vector<4x1xf32>
      %161 = arith.mulf %160, %143 : vector<4x1xf32>
      %162 = arith.subf %151, %161 : vector<4x1xf32>
      %163 = arith.addf %162, %158 : vector<4x1xf32>
      %cst_125 = arith.constant 1.1920929E-7 : f32
      %164 = vector.broadcast %cst_125 : f32 to vector<4x1xf32>
      %165 = arith.addf %158, %164 : vector<4x1xf32>
      %166 = math.log %165 : vector<4x1xf32>
      %cst_126 = arith.constant 1.1920929E-7 : f32
      %167 = vector.broadcast %cst_126 : f32 to vector<4x1xf32>
      %168 = arith.addf %163, %167 : vector<4x1xf32>
      %169 = math.log %168 : vector<4x1xf32>
      %170 = arith.subf %166, %169 : vector<4x1xf32>
      %cst_127 = arith.constant 4.34294462 : f32
      %171 = vector.broadcast %cst_127 : f32 to vector<4x1xf32>
      %172 = arith.mulf %171, %170 : vector<4x1xf32>
      %173 = arith.mulf %119, %123 : vector<4x1xf32>
      %cst_128 = arith.constant 4.8828125E-4 : f32
      %174 = vector.broadcast %cst_128 : f32 to vector<4x1xf32>
      %175 = arith.mulf %173, %174 : vector<4x1xf32>
      %176 = arith.subf %139, %175 : vector<4x1xf32>
      %177 = arith.mulf %123, %123 : vector<4x1xf32>
      %cst_129 = arith.constant 4.8828125E-4 : f32
      %178 = vector.broadcast %cst_129 : f32 to vector<4x1xf32>
      %179 = arith.mulf %177, %178 : vector<4x1xf32>
      %180 = arith.subf %131, %179 : vector<4x1xf32>
      %181 = arith.mulf %119, %119 : vector<4x1xf32>
      %cst_130 = arith.constant 4.8828125E-4 : f32
      %182 = vector.broadcast %cst_130 : f32 to vector<4x1xf32>
      %183 = arith.mulf %181, %182 : vector<4x1xf32>
      %184 = arith.subf %127, %183 : vector<4x1xf32>
      %cst_131 = arith.constant 1.1920929E-7 : f32
      %185 = vector.broadcast %cst_131 : f32 to vector<4x1xf32>
      %186 = arith.addf %176, %185 : vector<4x1xf32>
      %cst_132 = arith.constant 1.1920929E-7 : f32
      %187 = vector.broadcast %cst_132 : f32 to vector<4x1xf32>
      %188 = arith.addf %180, %187 : vector<4x1xf32>
      %189 = arith.divf %186, %188 : vector<4x1xf32>
      %190 = arith.mulf %189, %189 : vector<4x1xf32>
      %191 = arith.mulf %190, %180 : vector<4x1xf32>
      %cst_133 = arith.constant 2.000000e+00 : f32
      %192 = vector.broadcast %cst_133 : f32 to vector<4x1xf32>
      %193 = arith.mulf %192, %189 : vector<4x1xf32>
      %194 = arith.mulf %193, %176 : vector<4x1xf32>
      %195 = arith.subf %184, %194 : vector<4x1xf32>
      %196 = arith.addf %195, %191 : vector<4x1xf32>
      %cst_134 = arith.constant 1.1920929E-7 : f32
      %197 = vector.broadcast %cst_134 : f32 to vector<4x1xf32>
      %198 = arith.addf %191, %197 : vector<4x1xf32>
      %199 = math.log %198 : vector<4x1xf32>
      %cst_135 = arith.constant 1.1920929E-7 : f32
      %200 = vector.broadcast %cst_135 : f32 to vector<4x1xf32>
      %201 = arith.addf %196, %200 : vector<4x1xf32>
      %202 = math.log %201 : vector<4x1xf32>
      %203 = arith.subf %199, %202 : vector<4x1xf32>
      %cst_136 = arith.constant 4.34294462 : f32
      %204 = vector.broadcast %cst_136 : f32 to vector<4x1xf32>
      %205 = arith.mulf %204, %203 : vector<4x1xf32>
      %206 = arith.addf %172, %205 : vector<4x1xf32>
      %207 = arith.mulf %119, %121 : vector<4x1xf32>
      %cst_137 = arith.constant 4.8828125E-4 : f32
      %208 = vector.broadcast %cst_137 : f32 to vector<4x1xf32>
      %209 = arith.mulf %207, %208 : vector<4x1xf32>
      %210 = arith.subf %137, %209 : vector<4x1xf32>
      %211 = arith.mulf %121, %121 : vector<4x1xf32>
      %cst_138 = arith.constant 4.8828125E-4 : f32
      %212 = vector.broadcast %cst_138 : f32 to vector<4x1xf32>
      %213 = arith.mulf %211, %212 : vector<4x1xf32>
      %214 = arith.subf %129, %213 : vector<4x1xf32>
      %215 = arith.mulf %119, %119 : vector<4x1xf32>
      %cst_139 = arith.constant 4.8828125E-4 : f32
      %216 = vector.broadcast %cst_139 : f32 to vector<4x1xf32>
      %217 = arith.mulf %215, %216 : vector<4x1xf32>
      %218 = arith.subf %127, %217 : vector<4x1xf32>
      %cst_140 = arith.constant 1.1920929E-7 : f32
      %219 = vector.broadcast %cst_140 : f32 to vector<4x1xf32>
      %220 = arith.addf %210, %219 : vector<4x1xf32>
      %cst_141 = arith.constant 1.1920929E-7 : f32
      %221 = vector.broadcast %cst_141 : f32 to vector<4x1xf32>
      %222 = arith.addf %214, %221 : vector<4x1xf32>
      %223 = arith.divf %220, %222 : vector<4x1xf32>
      %224 = arith.mulf %223, %223 : vector<4x1xf32>
      %225 = arith.mulf %224, %214 : vector<4x1xf32>
      %cst_142 = arith.constant 2.000000e+00 : f32
      %226 = vector.broadcast %cst_142 : f32 to vector<4x1xf32>
      %227 = arith.mulf %226, %223 : vector<4x1xf32>
      %228 = arith.mulf %227, %210 : vector<4x1xf32>
      %229 = arith.subf %218, %228 : vector<4x1xf32>
      %230 = arith.addf %229, %225 : vector<4x1xf32>
      %cst_143 = arith.constant 1.1920929E-7 : f32
      %231 = vector.broadcast %cst_143 : f32 to vector<4x1xf32>
      %232 = arith.addf %225, %231 : vector<4x1xf32>
      %233 = math.log %232 : vector<4x1xf32>
      %cst_144 = arith.constant 1.1920929E-7 : f32
      %234 = vector.broadcast %cst_144 : f32 to vector<4x1xf32>
      %235 = arith.addf %230, %234 : vector<4x1xf32>
      %236 = math.log %235 : vector<4x1xf32>
      %237 = arith.subf %233, %236 : vector<4x1xf32>
      %cst_145 = arith.constant 4.34294462 : f32
      %238 = vector.broadcast %cst_145 : f32 to vector<4x1xf32>
      %239 = arith.mulf %238, %237 : vector<4x1xf32>
      %240 = arith.mulf %117, %123 : vector<4x1xf32>
      %cst_146 = arith.constant 4.8828125E-4 : f32
      %241 = vector.broadcast %cst_146 : f32 to vector<4x1xf32>
      %242 = arith.mulf %240, %241 : vector<4x1xf32>
      %243 = arith.subf %135, %242 : vector<4x1xf32>
      %244 = arith.mulf %123, %123 : vector<4x1xf32>
      %cst_147 = arith.constant 4.8828125E-4 : f32
      %245 = vector.broadcast %cst_147 : f32 to vector<4x1xf32>
      %246 = arith.mulf %244, %245 : vector<4x1xf32>
      %247 = arith.subf %131, %246 : vector<4x1xf32>
      %248 = arith.mulf %117, %117 : vector<4x1xf32>
      %cst_148 = arith.constant 4.8828125E-4 : f32
      %249 = vector.broadcast %cst_148 : f32 to vector<4x1xf32>
      %250 = arith.mulf %248, %249 : vector<4x1xf32>
      %251 = arith.subf %125, %250 : vector<4x1xf32>
      %cst_149 = arith.constant 1.1920929E-7 : f32
      %252 = vector.broadcast %cst_149 : f32 to vector<4x1xf32>
      %253 = arith.addf %243, %252 : vector<4x1xf32>
      %cst_150 = arith.constant 1.1920929E-7 : f32
      %254 = vector.broadcast %cst_150 : f32 to vector<4x1xf32>
      %255 = arith.addf %247, %254 : vector<4x1xf32>
      %256 = arith.divf %253, %255 : vector<4x1xf32>
      %257 = arith.mulf %256, %256 : vector<4x1xf32>
      %258 = arith.mulf %257, %247 : vector<4x1xf32>
      %cst_151 = arith.constant 2.000000e+00 : f32
      %259 = vector.broadcast %cst_151 : f32 to vector<4x1xf32>
      %260 = arith.mulf %259, %256 : vector<4x1xf32>
      %261 = arith.mulf %260, %243 : vector<4x1xf32>
      %262 = arith.subf %251, %261 : vector<4x1xf32>
      %263 = arith.addf %262, %258 : vector<4x1xf32>
      %cst_152 = arith.constant 1.1920929E-7 : f32
      %264 = vector.broadcast %cst_152 : f32 to vector<4x1xf32>
      %265 = arith.addf %258, %264 : vector<4x1xf32>
      %266 = math.log %265 : vector<4x1xf32>
      %cst_153 = arith.constant 1.1920929E-7 : f32
      %267 = vector.broadcast %cst_153 : f32 to vector<4x1xf32>
      %268 = arith.addf %263, %267 : vector<4x1xf32>
      %269 = math.log %268 : vector<4x1xf32>
      %270 = arith.subf %266, %269 : vector<4x1xf32>
      %cst_154 = arith.constant 4.34294462 : f32
      %271 = vector.broadcast %cst_154 : f32 to vector<4x1xf32>
      %272 = arith.mulf %271, %270 : vector<4x1xf32>
      %273 = arith.addf %239, %272 : vector<4x1xf32>
      %274 = arith.maximumf %206, %273 : vector<4x1xf32>
      %cst_155 = arith.constant 0.000000e+00 : f32
      %275 = vector.broadcast %cst_155 : f32 to vector<4x1xf32>
      %276 = arith.subf %275, %274 : vector<4x1xf32>
      %c0_156 = arith.constant 0 : index
      %c0_157 = arith.constant 0 : index
      %277 = vector.load %arg5[%c0_156, %c0_157] : memref<4x1xf32, #tpu.memory_space<vmem>>, vector<4x1xf32>
      tpu.vector_store %arg5[%c0_156, %c0_157], %276 {strides = array<i32>} : memref<4x1xf32, #tpu.memory_space<vmem>>, vector<4x1xf32>,
    } else {
    }
    return
  }
  func.func @transform_0(%arg0: i32, %arg1: i32) -> (i32, i32) {
    %c0_i32 = arith.constant 0 : i32
    return %arg0, %arg1 : i32, i32
  }
  func.func @transform_1(%arg0: i32, %arg1: i32) -> (i32, i32) {
    %c0_i32 = arith.constant 0 : i32
    return %arg0, %arg1 : i32, i32
  }
  func.func @transform_2(%arg0: i32, %arg1: i32) -> (i32, i32, i32) {
    %c0_i32 = arith.constant 0 : i32
    %c0_i32_0 = arith.constant 0 : i32
    return %arg0, %c0_i32, %arg1 : i32, i32, i32
  }
  func.func @transform_3(%arg0: i32, %arg1: i32) -> (i32, i32) {
    %c0_i32 = arith.constant 0 : i32
    %c0_i32_0 = arith.constant 0 : i32
    return %arg0, %c0_i32 : i32, i32
  }
}

</mosaic_0001>

<bundles_post_ra>
// kernel: tpu_custom_call.1
= control target key start
LH: loop header
LB: loop body
LE: loop exit
PB: predicated region body
PF: predicated region fallthrough
CT: control target
= control target key end

     0   :  { %8 = vsyncpa [#allocation4], 0  ;;  %s1707_s0 = inlined_call_operand.hbm [shape: f32[4,2048], index: 0, kind: input, shape index: {}]   ;;  %s1708_s1 = inlined_call_operand.hbm [shape: f32[4,2048], index: 1, kind: input, shape index: {}]   ;;  %s1709_s2 = inlined_call_operand.hbm [shape: f32[4,2,2048], index: 2, kind: input, shape index: {}]   ;;  %s1710_s3 = inlined_call_operand.vmem [shape: f32[4,1], index: 3, kind: output, shape index: {}]  }
   0x1   :  { %10 = vsyncpa [#allocation4 + $0x1], 0 }
   0x2   :  { %11 = vsyncpa [#allocation6], 0 }
   0x3   :  { %13 = vsyncpa [#allocation6 + $0x1], 0  ;;  %s1324_s12 = smov 0   ;;  %s1326_s13 = smov 0  }
   0x4   :  { %s1328_s14 = smov 0   ;;  %s1330_s15 = smov 0  }
   0x5   :  { %s1332_s16 = smov 0   ;;  %s1334_s17 = smov 0  }
   0x6 LB: > { %s1023_s18 = sadd.s32 4294967295, %s1293_s17   ;;  %s28_s19 = sadd.s32 1, %s1289_s16  ;;  %s1293_s17 = sphi %s1334_s17, %s19_s17   ;;  %s1289_s16 = sphi %s1332_s16, %s1725_s16   ;;  %s1285_s15 = sphi %s1330_s15, %s1724_s15   ;;  %s1281_s14 = sphi %s1328_s14, %s1723_s14   ;;  %s1277_s13 = sphi %s1326_s13, %s1722_s13   ;;  %s1273_s12 = sphi %s1324_s12, %s1721_s12  }
   0x7   : > { %p29_p0 = scmp.ge.s32.totalorder %s28_s19, 4  ;;  %s40_s20 = sadd.s32 1, %s1281_s14 }
   0x8   : > { %p47_p1 = scmp.ne.s32.totalorder %s1281_s14, %s1277_s13  ;;  %p48_p2 = scmp.eq.s32.totalorder %s1293_s17, 0 }
   0x9   : > { %s1727_s19 = smov (%p29_p0, %s28_s19), 0  ;;  %p53_p4 = scmp.ne.s32.totalorder %s1277_s13, %s1273_s12 }
   0xa   : > { %p49_p3 = por %p48_p2, %p47_p1  ;;  %s36_s21 = ssub.s32 %s1289_s16, %s1727_s19 }
   0xb   : > { %p54_p5 = scmp.eq.s32.totalorder %s1023_s18, 0  ;;  %p38_p6 = scmp.eq.s32.totalorder %s36_s21, 0 }
   0xc   : > { %p1070_p8 = scmp.lt.s32.totalorder %s1293_s17, 4  ;;  %s1374_s24 = sand.u32 1, %s1281_s14  }
   0xd   : > { %p1365_p7 = por %p54_p5, %p53_p4  ;;  %s1051_s25 = sshll.u32 %s1289_s16, 8 }
   0xe   : > { %s1371_s23 = scalar_select %p38_p6, %s1281_s14, %s40_s20  }
   0xf   : > { %s1714_s22 = scalar_select %p1365_p7, 1, 0 }
  0x10   : > { %s1026_s26 = sshll.u32 %s1374_s24, 4  ;;  %p1378_p9 = pnand %p1070_p8, %p49_p3 }
  0x11   : > { %s180_s28 = sand.u32 1, %s1293_s17   ;;  %s1388_s4 = scalar_lea.hbm %s1708_s1, %s1051_s25 }
  0x12   : > { %s1715_s27 = scalar_select %p1378_p9, 1, 0 }
  0x13   : > { %s184_s5 = scalar_lea.vmem [#allocation5], %s1026_s26  ;;  %s1032_s7 = sshll.u32 %s1374_s24, 5 }
  0x14   : > { %s194_s6 = sshll.u32 %s184_s5, 4  ;;  %s1395_s8 = scalar_lea.sflag [#allocation6], %s180_s28  ;;  %s1392_s6 = int_to_ptr.vmem [resolvable:$true] %s194_s6 }
  0x15   : > { %s1149_s9 = scalar_lea.hbm %s1388_s4, 256  ;;  %p1401_p11 = pneg %p1378_p9 }
  0x16   : > { %p1150_p10 = scmp.ne.s32.totalorder %s1388_s4, %s1149_s9  ;;  %s1154_s20 = scalar_lea.hbm %s1708_s1, 1024 }
  0x17   : > { %p1155_p0 = scmp.lt.u32.totalorder %s1388_s4, %s1708_s1  ;;  %p1156_p1 = scmp.lt.u32.totalorder %s1154_s20, %s1149_s9 }
  0x18   : > { %p1152_p12 = pnand %p1401_p11, %p1150_p10  ;;  %p1158_p3 = scmp.lt.u32.totalorder %s1149_s9, %s1388_s4 }
  0x19   : > { %p1157_p2 = por %p1156_p1, %p1155_p0 }
  0x1a   : > { %p1153_p13 = pneg %p1152_p12 }
  0x1b   : > { %p1159_p4 = por %p1158_p3, %p1157_p2 }
  0x1d   : > { %p1160_p5 = pnand %p1159_p4, %p1153_p13 }
  0x1f   : > { %1163 = shalt.err (!%p1160_p5)
}
  0x20   : > { %s1164_s28 = scalar_lea.vmem %s1392_s6, 256  ;;  %s1295_s30 = smov [#allocation5]  }
  0x21   : > { %p1165_p6 = scmp.ne.s32.totalorder %s1392_s6, %s1164_s28  ;;  %s1169_s5 = sshll.u32 %s1295_s30, 4  ;;  %s1170_s5 = int_to_ptr.vmem [resolvable:$false] %s1169_s5 }
  0x22   : > { %s1171_s11 = scalar_lea.vmem %s1170_s5, 512  ;;  %p1172_p12 = scmp.lt.s32.totalorder %s1392_s6, %s1170_s5 }
  0x23   : > { %p1167_p8 = pnand %p1165_p6, %p1401_p11  ;;  %p1173_p7 = scmp.lt.s32.totalorder %s1171_s11, %s1164_s28 }
  0x25   : > { %p1168_p10 = pneg %p1167_p8  ;;  %p1174_p0 = por %p1173_p7, %p1172_p12 }
  0x27   : > { %p1175_p1 = pnand %p1174_p0, %p1168_p10 }
  0x29   : > { %1178 = shalt.err (!%p1175_p1)
}
  0x2a   : > { %1066 = dma.hbm_to_vmem [thread:$0]  (!%p1378_p9), %s1388_s4, 256, %s1392_s6, %s1395_s8  }
  0x2b   : > { %s1053_s9 = sshll.u32 %s1289_s16, 7  ;;  %s205_s29 = scalar_lea.vmem [#allocation7], %s1032_s7 }
  0x2c   : > { %s1429_s21 = scalar_lea.hbm %s1709_s2, %s1053_s9  ;;  %s215_s28 = sshll.u32 %s205_s29, 4  ;;  %s1433_s28 = int_to_ptr.vmem [resolvable:$true] %s215_s28 }
  0x2d   : > { %p1035_p7 = scmp.ge.s32.totalorder %s1293_s17, 1  ;;  %p223_p13 = scmp.lt.s32.totalorder %s1293_s17, 5 }
  0x2e   : > { %s1446_s5 = scalar_lea.hbm %s1707_s0, %s1051_s25  ;;  %s163_s7 = scalar_lea.vmem [#allocation3], %s1026_s26 }
  0x2f   : > { %p1437_p2 = pnand %p1035_p7, %p223_p13  ;;  %s173_s11 = sshll.u32 %s163_s7, 4  ;;  %s174_s11 = int_to_ptr.vmem [resolvable:$true] %s173_s11 }
  0x30   : > { %s160_s9 = scalar_lea.sflag [#allocation4], %s1374_s24  ;;  %s1179_s12 = scalar_lea.hbm %s1446_s5, 256 }
  0x31   : > { %s1717_s30 = scalar_select %p1437_p2, 1, 0 }
  0x32   : > { %p1180_p3 = scmp.ne.s32.totalorder %s1446_s5, %s1179_s12  ;;  %s1184_s4 = scalar_lea.hbm %s1707_s0, 1024 }
  0x33   : > { %p1185_p6 = scmp.lt.u32.totalorder %s1446_s5, %s1707_s0  ;;  %p1186_p8 = scmp.lt.u32.totalorder %s1184_s4, %s1179_s12 }
  0x34   : > { %p1182_p4 = pnand %p1180_p3, %p1401_p11  ;;  %p1188_p12 = scmp.lt.u32.totalorder %s1179_s12, %s1446_s5 }
  0x35   : > { %p1187_p10 = por %p1186_p8, %p1185_p6 }
  0x36   : > { %p1183_p5 = pneg %p1182_p4 }
  0x37   : > { %p1189_p0 = por %p1188_p12, %p1187_p10 }
  0x39   : > { %p1190_p1 = pnand %p1189_p0, %p1183_p5 }
  0x3b   : > { %1193 = shalt.err (!%p1190_p1)
}
  0x3c   : > { %s1194_s24 = scalar_lea.vmem %s174_s11, 256  ;;  %s1296_s26 = smov [#allocation3]  }
  0x3d   : > { %p1195_p7 = scmp.ne.s32.totalorder %s174_s11, %s1194_s24  ;;  %s1199_s7 = sshll.u32 %s1296_s26, 4  ;;  %s1200_s7 = int_to_ptr.vmem [resolvable:$false] %s1199_s7 }
  0x3e   : > { %s1201_s20 = scalar_lea.vmem %s1200_s7, 512  ;;  %p1202_p4 = scmp.lt.s32.totalorder %s174_s11, %s1200_s7 }
  0x3f   : > { %p1197_p13 = pnand %p1195_p7, %p1401_p11  ;;  %p1203_p2 = scmp.lt.s32.totalorder %s1201_s20, %s1194_s24 }
  0x41   : > { %p1198_p3 = pneg %p1197_p13  ;;  %p1204_p9 = por %p1203_p2, %p1202_p4 }
  0x43   : > { %p1205_p6 = pnand %p1204_p9, %p1198_p3 }
  0x45   : > { %1208 = shalt.err (!%p1205_p6)
}
  0x46   : > { %p1718_p8 = scmp.ne.s32.totalorder %s1715_s27, 0  ;;  %s1209_s12 = scalar_lea.hbm %s1429_s21, 512 }
  0x47   : > { %p1210_p5 = scmp.ne.s32.totalorder %s1429_s21, %s1209_s12  ;;  %s1214_s25 = scalar_lea.hbm %s1709_s2, 2048 }
  0x48   : > { %1063 = dma.hbm_to_vmem [thread:$0]  (!%p1718_p8), %s1446_s5, 256, %s174_s11, %s160_s9  }
  0x49   : > { %p1212_p10 = pnand %p1210_p5, %p1401_p11  ;;  %p1215_p9 = scmp.lt.u32.totalorder %s1429_s21, %s1709_s2 }
  0x4a   : > { %p1216_p2 = scmp.lt.u32.totalorder %s1214_s25, %s1209_s12  ;;  %p1218_p1 = scmp.lt.u32.totalorder %s1209_s12, %s1429_s21 }
  0x4b   : > { %p1213_p12 = pneg %p1212_p10 }
  0x4c   : > { %p1217_p0 = por %p1216_p2, %p1215_p9 }
  0x4e   : > { %p1219_p7 = por %p1218_p1, %p1217_p0 }
  0x50   : > { %p1220_p13 = pnand %p1219_p7, %p1213_p12 }
  0x52   : > { %1223 = shalt.err (!%p1220_p13)
}
  0x53   : > { %s1224_s5 = scalar_lea.vmem %s1433_s28, 512  ;;  %s1297_s11 = smov [#allocation7]  }
  0x54   : > { %p1225_p3 = scmp.ne.s32.totalorder %s1433_s28, %s1224_s5  ;;  %s1229_s9 = sshll.u32 %s1297_s11, 4  ;;  %s1230_s9 = int_to_ptr.vmem [resolvable:$false] %s1229_s9 }
  0x55   : > { %s1231_s26 = scalar_lea.vmem %s1230_s9, 1024  ;;  %p1232_p5 = scmp.lt.s32.totalorder %s1433_s28, %s1230_s9 }
  0x56   : > { %p1227_p4 = pnand %p1225_p3, %p1401_p11  ;;  %p1233_p10 = scmp.lt.s32.totalorder %s1231_s26, %s1224_s5 }
  0x58   : > { %p1228_p6 = pneg %p1227_p4  ;;  %p1234_p9 = por %p1233_p10, %p1232_p5 }
  0x5a   : > { %p1235_p2 = pnand %p1234_p9, %p1228_p6 }
  0x5c   : > { %1238 = shalt.err (!%p1235_p2)
}
  0x5d   : > { %s1298_s7 = smov 512   ;;  %s1299_s20 = smov 128  }
  0x5e   : > { %s1300_s12 = smov 8   ;;  %p1719_p11 = scmp.ne.s32.totalorder %s1717_s30, 0 }
  0x5f   : > { %1069 = dma.hbm_to_vmem [thread:$0]  (!%p1718_p8), %s1429_s21, 512, %s1433_s28, %s1395_s8, %s1298_s7, %s1299_s20, %s1300_s12  }
  0x60   : > { %227 = sbr.rel (%p1719_p11) target bundleno = 364 (0x16c), region = 32  ;;  %s229_s10 = sand.u32 (!%p1719_p11), 1, %s1277_s13  }
  0x61   : > { %s1036_s29 = sshll.u32 (!%p1719_p11), %s229_s10, 4  ;;  %s230_s4 = scalar_lea.sflag (!%p1719_p11), [#allocation4], %s229_s10 }
  0x62   : > { %s1493_s25 = scalar_lea.vmem (!%p1719_p11), [#allocation3], %s1036_s29  ;;  %p1720_p12 = scmp.ne.s32.totalorder (!%p1719_p11), %s1714_s22, 0 }
  0x67   : > { %1264 = dma.done.wait (%p1720_p12), %s230_s4, 256  }
  0x68   : > { %1266 = vsyncadd (%p1720_p12), %s230_s4, 4294967040  ;;  %s238_s27 = sand.u32 1, %s1023_s18   ;;  %s242_s21 = scalar_lea.vmem [#allocation5], %s1036_s29 }
  0x69   : > { %s239_s8 = scalar_lea.sflag [#allocation6], %s238_s27 }
  0x6a   : > { %1268 = dma.done.wait (%p1720_p12), %s239_s8, 768  }
  0x6b   : > { %1270 = vsyncadd (%p1720_p12), %s239_s8, 4294966528  ;;  %s1038_s28 = sshll.u32 %s229_s10, 5  ;;  %p1039_p8 = scmp.ne.s32.totalorder %s1285_s15, 0 }
  0x6c   : > { %s1505_s30 = scalar_lea.vmem [#allocation7], %s1038_s28  ;;  %vm295_vm0 = vcmask (!%p1039_p8), 3072   ;;  %v1301_v0 = vmov (!%p1039_p8), 0.0  }
  0x6d   : > { %294 = sbr.rel (%p1039_p8) target bundleno = 116 (0x74), region = 48  ;;  %296 = vst.msk [vmem:[#allocation2] sm:$0xf] (!%p1039_p8), %vm295_vm0, %v1301_v0  ;;  %297 = vst.msk [vmem:[#allocation2 + $0x4] sm:$0xf] (!%p1039_p8), %vm295_vm0, %v1301_v0 }
  0x6e   : > { %298 = vst.msk [vmem:[#allocation2 + $0x8] sm:$0xf] (!%p1039_p8), %vm295_vm0, %v1301_v0  ;;  %299 = vst.msk [vmem:[#allocation2 + $0xc] sm:$0xf] (!%p1039_p8), %vm295_vm0, %v1301_v0 }
  0x6f   : > { %300 = vst.msk [vmem:[#allocation2 + $0x10] sm:$0xf] (!%p1039_p8), %vm295_vm0, %v1301_v0  ;;  %301 = vst.msk [vmem:[#allocation2 + $0x14] sm:$0xf] (!%p1039_p8), %vm295_vm0, %v1301_v0 }
  0x70   : > { %302 = vst.msk [vmem:[#allocation2 + $0x18] sm:$0xf] (!%p1039_p8), %vm295_vm0, %v1301_v0  ;;  %303 = vst.msk [vmem:[#allocation2 + $0x1c] sm:$0xf] (!%p1039_p8), %vm295_vm0, %v1301_v0 }
  0x71   : > { %304 = vst.msk [vmem:[#allocation2 + $0x20] sm:$0xf] (!%p1039_p8), %vm295_vm0, %v1301_v0  ;;  %305 = vst.msk [vmem:[#allocation2 + $0x24] sm:$0xf] (!%p1039_p8), %vm295_vm0, %v1301_v0 }
  0x72   : > { %306 = vst.msk [vmem:[#allocation2 + $0x28] sm:$0xf] (!%p1039_p8), %vm295_vm0, %v1301_v0  ;;  %307 = vst.msk [vmem:[#allocation2 + $0x2c] sm:$0xf] (!%p1039_p8), %vm295_vm0, %v1301_v0 }
  0x74 PF: > { %v1508_v1 = vld [vmem:[%s242_s21] sm:$0xff]  ;;  %v1510_v2 = vld [vmem:[%s242_s21 + $0x8] sm:$0xff]  ;;  %vm333_vm1 = vcmask 1043456   ;;  %v367_v4 = vlaneseq  ;;  %v1302_v14 = vmov 1966171168   ;;  %vm742_vm2 = vcmask 3072  }
  0x75   : > { %v1513_v3 = vld [vmem:[%s1493_s25] sm:$0xff]  ;;  %v477_v5 = vmul.f32 %v1508_v1, %v1508_v1  ;;  %v478_v6 = vmul.f32 %v1510_v2, %v1510_v2  ;;  %v1520_v7 = vld [vmem:[%s1493_s25 + $0x8] sm:$0xff]  ;;  %v365_v15 = vunpack.c.l.s4 %v1302_v14  ;;  %v345_v34 = vcombine.high %v1508_v1, %v1508_v1  ;;  %p1047_p0 = scmp.ne.s32.totalorder %s1285_s15, 3 }
  0x76   : > { %v329_v8 = vcombine.high %v1513_v3, %v1513_v3  ;;  %v334_v9 = vsel %vm333_vm1, %v1513_v3, 0.0  ;;  %v1527_v10 = vld [vmem:[%s1505_s30] ss:$2 sm:$0xf]  ;;  %v330_v11 = vcombine.high %v1520_v7, %v1520_v7  ;;  %v337_v12 = vsel %vm333_vm1, %v1520_v7, 0.0 }
  0x77   : > { %v1534_v13 = vld [vmem:[%s1505_s30 + $0x8] ss:$2 sm:$0xf]  ;;  %v1536_v16 = vshrl.u32 %v367_v4, 7  ;;  %v481_v17 = vcombine.high %v477_v5, %v477_v5  ;;  %v482_v18 = vcombine.high %v478_v6, %v478_v6  ;;  %v485_v19 = vsel %vm333_vm1, %v477_v5, 0.0 }
  0x78   : > { %v488_v20 = vsel %vm333_vm1, %v478_v6, 0.0  ;;  %v1541_v21 = vld [vmem:[%s1505_s30 + $0x10] ss:$2 sm:$0xf]  ;;  %v335_v22 = vsel %vm333_vm1, %v329_v8, 0.0  ;;  %v339_v23 = vsel %vm333_vm1, %v330_v11, 0.0  ;;  %v362_v25 = vcombine.low %v1527_v10, %v1534_v13 }
  0x79   : > { %v1546_v24 = vld [vmem:[%s1505_s30 + $0x18] ss:$2 sm:$0xf]  ;;  %v366_v26 = vunpack.c.0.s8 %v365_v15  ;;  %v486_v27 = vsel %vm333_vm1, %v481_v17, 0.0  ;;  %v490_v28 = vsel %vm333_vm1, %v482_v18, 0.0  ;;  %v336_v29 = vadd.f32 %v335_v22, %v334_v9 }
  0x7a   : > { %v363_v30 = vcombine.low %v1541_v21, %v1546_v24  ;;  %v1555_v31 = vld [vmem:[%s1505_s30 + $0x1] ss:$2 sm:$0xf]  ;;  %v487_v32 = vadd.f32 %v486_v27, %v485_v19  ;;  %v346_v35 = vcombine.high %v1510_v2, %v1510_v2  ;;  %v1565_v36 = vld [vmem:[%s1505_s30 + $0x9] ss:$2 sm:$0xf]  ;;  %v460_v57 = vmul.f32 %v1513_v3, %v1513_v3 }
  0x7b   : > { %v1558_v33 = vsub.s32 %v366_v26, %v1536_v16  ;;  %v1568_v37 = vld [vmem:[%s1505_s30 + $0x11] ss:$2 sm:$0xf]  ;;  %v338_v38 = vadd.f32 %v337_v12, %v336_v29  ;;  %v349_v39 = vsel %vm333_vm1, %v1508_v1, 0.0  ;;  %v352_v40 = vsel %vm333_vm1, %v1510_v2, 0.0 }
  0x7c   : > { %v1575_v41 = vld [vmem:[%s1505_s30 + $0x19] ss:$2 sm:$0xf]  ;;  %v413_v42 = vcombine.low %v1555_v31, %v1565_v36  ;;  %v489_v43 = vadd.f32 %v488_v20, %v487_v32  ;;  %v350_v46 = vsel %vm333_vm1, %v345_v34, 0.0  ;;  %v354_v49 = vsel %vm333_vm1, %v346_v35, 0.0 }
  0x7d   : > { %v370_v44 = vrot.slane %v362_v25, %v1558_v33  ;;  %v377_v45 = vrot.slane %v363_v30, %v1558_v33  ;;  %v340_v47 = vadd.f32 %v339_v23, %v338_v38  ;;  %v351_v48 = vadd.f32 %v350_v46, %v349_v39 }
  0x7e   : > { %v414_v50 = vcombine.low %v1568_v37, %v1575_v41  ;;  %v491_v51 = vadd.f32 %v490_v28, %v489_v43  ;;  %v421_v54 = vrot.slane %v413_v42, %v1558_v33  ;;  %v461_v58 = vmul.f32 %v1520_v7, %v1520_v7 }
  0x7f   : > { %v378_v52 = vcombine.low %v370_v44, %v377_v45  ;;  %v379_v53 = vcombine.high %v370_v44, %v377_v45  ;;  %341 = vadd.xlane.f32.xlu0 %v340_v47  ;;  %v353_v55 = vadd.f32 %v352_v40, %v351_v48  ;;  %v549_v61 = vmul.f32 %v1555_v31, %v1555_v31 }
  0x80   : > { %v428_v56 = vrot.slane %v414_v50, %v1558_v33  ;;  %492 = vadd.xlane.f32.xlu1 %v491_v51  ;;  %v550_v62 = vmul.f32 %v1565_v36, %v1565_v36  ;;  %v464_v5 = vcombine.high %v460_v57, %v460_v57  ;;  %v465_v17 = vcombine.high %v461_v58, %v461_v58 }
  0x81   : > { %v386_v59 = vrot.slane %v378_v52, %v1558_v33  ;;  %v393_v60 = vrot.slane %v379_v53, %v1558_v33  ;;  %v355_v63 = vadd.f32 %v354_v49, %v353_v55  ;;  %v468_v20 = vsel %vm333_vm1, %v460_v57, 0.0 }
  0x82   : > { %v429_v0 = vcombine.low %v421_v54, %v428_v56  ;;  %v430_v4 = vcombine.high %v421_v54, %v428_v56  ;;  %v469_v22 = vsel %vm333_vm1, %v464_v5, 0.0  ;;  %v471_v30 = vsel %vm333_vm1, %v461_v58, 0.0 }
  0x83   : > { %v394_v6 = vcombine.high %v386_v59, %v386_v59  ;;  %v395_v8 = vcombine.high %v393_v60, %v393_v60  ;;  %v400_v9 = vsel %vm333_vm1, %v386_v59, 0.0  ;;  %v401_v11 = vsel %vm333_vm1, %v393_v60, 0.0  ;;  %356 = vadd.xlane.f32.xlu0 %v355_v63 }
  0x84   : > { %v402_v12 = vadd.f32 %v401_v11, %v400_v9  ;;  %v437_v14 = vrot.slane %v429_v0, %v1558_v33  ;;  %v444_v15 = vrot.slane %v430_v4, %v1558_v33  ;;  %v470_v29 = vadd.f32 %v469_v22, %v468_v20 }
  0x85   : > { %v403_v18 = vsel %vm333_vm1, %v394_v6, 0.0  ;;  %v405_v19 = vsel %vm333_vm1, %v395_v8, 0.0  ;;  %v473_v32 = vsel %vm333_vm1, %v465_v17, 0.0  ;;  %v551_v42 = vmul.f32 %v1568_v37, %v1568_v37 }
  0x86   : > { %v404_v23 = vadd.f32 %v403_v18, %v402_v12  ;;  %v445_v25 = vcombine.high %v437_v14, %v437_v14  ;;  %v446_v26 = vcombine.high %v444_v15, %v444_v15  ;;  %v451_v27 = vsel %vm333_vm1, %v437_v14, 0.0 }
  0x87   : > { %v452_v28 = vsel %vm333_vm1, %v444_v15, 0.0  ;;  %v472_v40 = vadd.f32 %v471_v30, %v470_v29  ;;  %v552_v43 = vmul.f32 %v1575_v41, %v1575_v41  ;;  %v557_v44 = vcombine.low %v549_v61, %v550_v62 }
  0x88   : > { %v406_v34 = vadd.f32 %v405_v19, %v404_v23  ;;  %v453_v35 = vadd.f32 %v452_v28, %v451_v27  ;;  %v454_v38 = vsel %vm333_vm1, %v445_v25, 0.0  ;;  %v456_v39 = vsel %vm333_vm1, %v446_v26, 0.0 }
  0x89   : > { %v494_v46 = vmul.f32 %v1527_v10, %v1527_v10  ;;  %v495_v47 = vmul.f32 %v1534_v13, %v1534_v13  ;;  %v496_v48 = vmul.f32 %v1541_v21, %v1541_v21  ;;  %v474_v49 = vadd.f32 %v473_v32, %v472_v40 }
  0x8a   : > { %407 = vadd.xlane.f32.xlu1 %v406_v34  ;;  %v455_v45 = vadd.f32 %v454_v38, %v453_v35  ;;  %v558_v50 = vcombine.low %v551_v42, %v552_v43  ;;  %v565_v51 = vrot.slane %v557_v44, %v1558_v33  ;;  %v497_v52 = vmul.f32 %v1546_v24, %v1546_v24 }
  0x8b   : > { %v502_v54 = vcombine.low %v494_v46, %v495_v47  ;;  %475 = vadd.xlane.f32.xlu0 %v474_v49  ;;  %v1303_v57 = vmov 1935823168   ;;  %v655_v0 = vcombine.low %v1555_v31, %v1568_v37  ;;  %v656_v4 = vcombine.low %v1565_v36, %v1575_v41 }
  0x8c   : > { %v457_v53 = vadd.f32 %v456_v39, %v455_v45  ;;  %v572_v55 = vrot.slane %v558_v50, %v1558_v33  ;;  %v503_v56 = vcombine.low %v496_v48, %v497_v52  ;;  %v607_v58 = vunpack.c.l.s4 %v1303_v57 }
  0x8d   : > { %v510_v59 = vrot.slane %v502_v54, %v1558_v33  ;;  %v604_v5 = vcombine.low %v1527_v10, %v1541_v21  ;;  %v605_v14 = vcombine.low %v1534_v13, %v1546_v24 }
  0x8e   : > { %458 = vadd.xlane.f32.xlu1 %v457_v53  ;;  %v573_v60 = vcombine.low %v565_v51, %v572_v55  ;;  %v574_v61 = vcombine.high %v565_v51, %v572_v55  ;;  %v517_v62 = vrot.slane %v503_v56, %v1558_v33  ;;  %v608_v63 = vunpack.c.0.s8 %v607_v58 }
  0x90   : > { %v581_v6 = vrot.slane %v573_v60, %v1558_v33  ;;  %v588_v8 = vrot.slane %v574_v61, %v1558_v33  ;;  %v518_v9 = vcombine.low %v510_v59, %v517_v62  ;;  %v519_v11 = vcombine.high %v510_v59, %v517_v62 }
  0x91   : > { %v611_v12 = vsub.s32 %v608_v63, %v1536_v16 }
  0x92   : > { %v589_v15 = vcombine.high %v581_v6, %v581_v6  ;;  %v590_v17 = vcombine.high %v588_v8, %v588_v8  ;;  %v595_v31 = vsel %vm333_vm1, %v581_v6, 0.0  ;;  %v596_v36 = vsel %vm333_vm1, %v588_v8, 0.0 }
  0x93   : > { %v597_v37 = vadd.f32 %v596_v36, %v595_v31  ;;  %v526_v10 = vrot.slane %v518_v9, %v1558_v33  ;;  %v533_v21 = vrot.slane %v519_v11, %v1558_v33  ;;  %v663_v41 = vrot.slane %v655_v0, %v611_v12 }
  0x94   : > { %v598_v18 = vsel %vm333_vm1, %v589_v15, 0.0  ;;  %v600_v19 = vsel %vm333_vm1, %v590_v17, 0.0  ;;  %v670_v16 = vrot.slane %v656_v4, %v611_v12  ;;  %v612_v20 = vrot.slane %v604_v5, %v611_v12 }
  0x95   : > { %v599_v22 = vadd.f32 %v598_v18, %v597_v37  ;;  %v534_v13 = vcombine.high %v526_v10, %v526_v10  ;;  %v535_v24 = vcombine.high %v533_v21, %v533_v21  ;;  %v540_v23 = vsel %vm333_vm1, %v526_v10, 0.0 }
  0x96   : > { %v541_v25 = vsel %vm333_vm1, %v533_v21, 0.0  ;;  %v671_v26 = vcombine.low %v663_v41, %v670_v16  ;;  %v672_v27 = vcombine.high %v663_v41, %v670_v16  ;;  %v619_v28 = vrot.slane %v605_v14, %v611_v12 }
  0x97   : > { %v601_v29 = vadd.f32 %v600_v19, %v599_v22  ;;  %v542_v30 = vadd.f32 %v541_v25, %v540_v23  ;;  %v543_v33 = vsel %vm333_vm1, %v534_v13, 0.0  ;;  %v545_v32 = vsel %vm333_vm1, %v535_v24, 0.0  ;;  %v740_v22 = vld [vmem:[#allocation2] sm:$0xf]  ;;  %v761_v13 = vld [vmem:[#allocation2 + $0x14] sm:$0xf] }
  0x98   : > { %v679_v34 = vrot.slane %v671_v26, %v611_v12  ;;  %v686_v35 = vrot.slane %v672_v27, %v611_v12  ;;  %v620_v38 = vcombine.low %v612_v20, %v619_v28  ;;  %v621_v39 = vcombine.high %v612_v20, %v619_v28  ;;  %v745_v27 = vld [vmem:[#allocation2 + $0x4] sm:$0xf] }
  0x99   : > { %602 = vadd.xlane.f32.xlu1 %v601_v29  ;;  %v544_v40 = vadd.f32 %v543_v33, %v542_v30  ;;  %v749_v30 = vld [vmem:[#allocation2 + $0x8] sm:$0xf] }
  0x9a   : > { %v689_v42 = vmul.f32 %v679_v34, %v1513_v3  ;;  %v690_v43 = vmul.f32 %v686_v35, %v1520_v7  ;;  %v628_v44 = vrot.slane %v620_v38, %v611_v12  ;;  %v635_v45 = vrot.slane %v621_v39, %v611_v12 }
  0x9b   : > { %v546_v46 = vadd.f32 %v545_v32, %v544_v40  ;;  %v723_v47 = vmul.f32 %v679_v34, %v1508_v1  ;;  %v724_v48 = vmul.f32 %v686_v35, %v1510_v2  ;;  %v757_v34 = vld [vmem:[#allocation2 + $0x10] sm:$0xf]  ;;  %v753_v35 = vld [vmem:[#allocation2 + $0xc] sm:$0xf] }
  0x9c   : > { %v693_v49 = vcombine.high %v689_v42, %v689_v42  ;;  %v694_v50 = vcombine.high %v690_v43, %v690_v43  ;;  %v697_v51 = vsel %vm333_vm1, %v689_v42, 0.0  ;;  %v638_v52 = vmul.f32 %v628_v44, %v1513_v3 }
  0x9d   : > { %547 = vadd.xlane.f32.xlu0 %v546_v46  ;;  %v639_v53 = vmul.f32 %v635_v45, %v1520_v7  ;;  %v727_v54 = vcombine.high %v723_v47, %v723_v47  ;;  %v728_v55 = vcombine.high %v724_v48, %v724_v48  ;;  %v700_v57 = vsel %vm333_vm1, %v690_v43, 0.0  ;;  %v769_v43 = vld [vmem:[#allocation2 + $0x1c] sm:$0xf]  ;;  %v765_v46 = vld [vmem:[#allocation2 + $0x18] sm:$0xf] }
  0x9e   : > { %v698_v56 = vsel %vm333_vm1, %v693_v49, 0.0  ;;  %v702_v58 = vsel %vm333_vm1, %v694_v50, 0.0  ;;  %v731_v59 = vsel %vm333_vm1, %v723_v47, 0.0  ;;  %v642_v61 = vcombine.high %v638_v52, %v638_v52  ;;  %v777_v49 = vld [vmem:[#allocation2 + $0x24] sm:$0xf] }
  0x9f   : > { %v699_v60 = vadd.f32 %v698_v56, %v697_v51  ;;  %v643_v62 = vcombine.high %v639_v53, %v639_v53  ;;  %v646_v63 = vsel %vm333_vm1, %v638_v52, 0.0  ;;  %v649_v0 = vsel %vm333_vm1, %v639_v53, 0.0  ;;  %v773_v52 = vld [vmem:[#allocation2 + $0x20] sm:$0xf]  ;;  %v785_v53 = vld [vmem:[#allocation2 + $0x2c] sm:$0xf] }
  0xa0   : > { %v732_v3 = vsel %vm333_vm1, %v727_v54, 0.0  ;;  %v734_v7 = vsel %vm333_vm1, %v724_v48, 0.0  ;;  %v706_v4 = vmul.f32 %v628_v44, %v1508_v1  ;;  %v647_v6 = vsel %vm333_vm1, %v642_v61, 0.0 }
  0xa1   : > { %v701_v5 = vadd.f32 %v700_v57, %v699_v60  ;;  %v733_v8 = vadd.f32 %v732_v3, %v731_v59  ;;  %v736_v9 = vsel %vm333_vm1, %v728_v55, 0.0  ;;  %v648_v11 = vadd.f32 %v647_v6, %v646_v63 }
  0xa2   : > { %v707_v12 = vmul.f32 %v635_v45, %v1510_v2  ;;  %v710_v14 = vcombine.high %v706_v4, %v706_v4  ;;  %v714_v15 = vsel %vm333_vm1, %v706_v4, 0.0  ;;  %v651_v31 = vsel %vm333_vm1, %v643_v62, 0.0 }
  0xa3   : > { %v703_v17 = vadd.f32 %v702_v58, %v701_v5  ;;  %v735_v36 = vadd.f32 %v734_v7, %v733_v8  ;;  %v650_v37 = vadd.f32 %v649_v0, %v648_v11  ;;  %v781_v58 = vld [vmem:[#allocation2 + $0x28] sm:$0xf] }
  0xa4   : > { %v711_v10 = vcombine.high %v707_v12, %v707_v12  ;;  %v715_v1 = vsel %vm333_vm1, %v710_v14, 0.0  ;;  %v717_v21 = vsel %vm333_vm1, %v707_v12, 0.0 }
  0xa5   : > { %704 = vadd.xlane.f32.xlu1 %v703_v17  ;;  %v737_v41 = vadd.f32 %v736_v9, %v735_v36  ;;  %v716_v18 = vadd.f32 %v715_v1, %v714_v15  ;;  %v652_v19 = vadd.f32 %v651_v31, %v650_v37 }
  0xa6   : > { %v719_v16 = vsel %vm333_vm1, %v711_v10, 0.0 }
  0xa7   : > { %v718_v2 = vadd.f32 %v717_v21, %v716_v18  ;;  %653 = vadd.xlane.f32.xlu0 %v652_v19 }
  0xa9   : > { %738 = vadd.xlane.f32.xlu1 %v737_v41  ;;  %v720_v20 = vadd.f32 %v719_v16, %v718_v2 }
  0xab   : > { %721 = vadd.xlane.f32.xlu0 %v720_v20 }
 0x10c   : > { %v342_v24 = vpop.xlane.xlu0 %341 }
 0x10d   : > { %v493_v23 = vpop.xlane.xlu1 %492  ;;  %v741_v25 = vadd.f32 %v740_v22, %v342_v24 }
 0x10e   : > { %v762_v26 = vadd.f32 %v761_v13, %v493_v23 }
 0x10f   : > { %743 = vst.msk [vmem:[#allocation2] sm:$0xf] %vm742_vm2, %v741_v25 }
 0x110   : > { %763 = vst.msk [vmem:[#allocation2 + $0x14] sm:$0xf] %vm742_vm2, %v762_v26  ;;  %v357_v28 = vpop.xlane.xlu0 %356 }
 0x111   : > { %v746_v29 = vadd.f32 %v745_v27, %v357_v28 }
 0x113   : > { %747 = vst.msk [vmem:[#allocation2 + $0x4] sm:$0xf] %vm742_vm2, %v746_v29 }
 0x116   : > { %v792_v0 = vld [vmem:[#allocation2] sm:$0xf] (!%p1047_p0) }
 0x117   : > { %v408_v33 = vpop.xlane.xlu1 %407  ;;  %v810_v22 = vmul.f32 (!%p1047_p0), %v792_v0, %v792_v0 }
 0x118   : > { %v750_v32 = vadd.f32 %v749_v30, %v408_v33  ;;  %v476_v38 = vpop.xlane.xlu0 %475 }
 0x119   : > { %v758_v40 = vadd.f32 %v757_v34, %v476_v38  ;;  %v811_v27 = vmul.f32 (!%p1047_p0), 0.00048828125, %v810_v22 }
 0x11a   : > { %751 = vst.msk [vmem:[#allocation2 + $0x8] sm:$0xf] %vm742_vm2, %v750_v32  ;;  %v793_v3 = vld [vmem:[#allocation2 + $0x4] sm:$0xf] (!%p1047_p0)  ;;  %v797_v32 = vld [vmem:[#allocation2 + $0x14] sm:$0xf] (!%p1047_p0) }
 0x11b   : > { %v459_v39 = vpop.xlane.xlu1 %458  ;;  %759 = vst.msk [vmem:[#allocation2 + $0x10] sm:$0xf] %vm742_vm2, %v758_v40  ;;  %v837_v24 = vmul.f32 (!%p1047_p0), %v793_v3, %v793_v3 }
 0x11c   : > { %v754_v42 = vadd.f32 %v753_v35, %v459_v39 }
 0x11d   : > { %v838_v28 = vmul.f32 (!%p1047_p0), 0.00048828125, %v837_v24 }
 0x11e   : > { %755 = vst.msk [vmem:[#allocation2 + $0xc] sm:$0xf] %vm742_vm2, %v754_v42 }
 0x11f   : > { %v839_v42 = vsub.f32 (!%p1047_p0), %v797_v32, %v838_v28 }
 0x121   : > { %v794_v61 = vld [vmem:[#allocation2 + $0x8] sm:$0xf] (!%p1047_p0) }
 0x122   : > { %v807_v63 = vmul.f32 (!%p1047_p0), %v794_v61, %v794_v61  ;;  %v804_v8 = vmul.f32 (!%p1047_p0), %v794_v61, %v792_v0  ;;  %v859_v11 = vmul.f32 (!%p1047_p0), %v794_v61, %v793_v3  ;;  %v796_v33 = vld [vmem:[#allocation2 + $0x10] sm:$0xf] (!%p1047_p0) }
 0x123   : > { %v812_v40 = vsub.f32 (!%p1047_p0), %v796_v33, %v811_v27 }
 0x124   : > { %v808_v6 = vmul.f32 (!%p1047_p0), 0.00048828125, %v807_v63  ;;  %v805_v36 = vmul.f32 (!%p1047_p0), 0.00048828125, %v804_v8  ;;  %v860_v10 = vmul.f32 (!%p1047_p0), 0.00048828125, %v859_v11 }
 0x125   : > { %v795_v62 = vld [vmem:[#allocation2 + $0xc] sm:$0xf] (!%p1047_p0) }
 0x126   : > { %v603_v44 = vpop.xlane.xlu1 %602  ;;  %v834_v7 = vmul.f32 (!%p1047_p0), %v795_v62, %v795_v62  ;;  %v831_v14 = vmul.f32 (!%p1047_p0), %v795_v62, %v793_v3  ;;  %v878_v15 = vmul.f32 (!%p1047_p0), %v795_v62, %v792_v0 }
 0x127   : > { %v770_v45 = vadd.f32 %v769_v43, %v603_v44 }
 0x128   : > { %v835_v9 = vmul.f32 (!%p1047_p0), 0.00048828125, %v834_v7  ;;  %v832_v41 = vmul.f32 (!%p1047_p0), 0.00048828125, %v831_v14  ;;  %v879_v18 = vmul.f32 (!%p1047_p0), 0.00048828125, %v878_v15 }
 0x129   : > { %771 = vst.msk [vmem:[#allocation2 + $0x1c] sm:$0xf] %vm742_vm2, %v770_v45 }
 0x12a   : > { %v548_v47 = vpop.xlane.xlu0 %547 }
 0x12b   : > { %v766_v48 = vadd.f32 %v765_v46, %v548_v47 }
 0x12d   : > { %767 = vst.msk [vmem:[#allocation2 + $0x18] sm:$0xf] %vm742_vm2, %v766_v48 }
 0x130   : > { %v799_v5 = vld [vmem:[#allocation2 + $0x1c] sm:$0xf] (!%p1047_p0) }
 0x131   : > { %v836_v17 = vsub.f32 (!%p1047_p0), %v799_v5, %v835_v9 }
 0x132   : > { %v705_v50 = vpop.xlane.xlu1 %704 }
 0x133   : > { %v778_v51 = vadd.f32 %v777_v49, %v705_v50  ;;  %v841_v37 = vadd.f32 (!%p1047_p0), 1.1920929e-07, %v836_v17 }
 0x134   : > { %v654_v54 = vpop.xlane.xlu0 %653  ;;  %v798_v4 = vld [vmem:[#allocation2 + $0x18] sm:$0xf] (!%p1047_p0) }
 0x135   : > { %779 = vst.msk [vmem:[#allocation2 + $0x24] sm:$0xf] %vm742_vm2, %v778_v51  ;;  %v774_v55 = vadd.f32 %v773_v52, %v654_v54  ;;  %791 = sbr.rel (%p1047_p0) target bundleno = 364 (0x16c), region = 52  ;;  %v809_v12 = vsub.f32 (!%p1047_p0), %v798_v4, %v808_v6 }
 0x136   : > { %v739_v56 = vpop.xlane.xlu1 %738 }
 0x137   : > { %v786_v57 = vadd.f32 %v785_v53, %v739_v56  ;;  %775 = vst.msk [vmem:[#allocation2 + $0x20] sm:$0xf] %vm742_vm2, %v774_v55  ;;  %v814_v31 = vadd.f32 (!%p1047_p0), 1.1920929e-07, %v809_v12 }
 0x138   : > { %v722_v59 = vpop.xlane.xlu0 %721 }
 0x139   : > { %787 = vst.msk [vmem:[#allocation2 + $0x2c] sm:$0xf] %vm742_vm2, %v786_v57  ;;  %v782_v60 = vadd.f32 %v781_v58, %v722_v59  ;;  %1129 = vrcp.f32 (!%p1047_p0), %v814_v31 }
 0x13a   : > { %1131 = vrcp.f32 (!%p1047_p0), %v841_v37 }
 0x13b   : > { %783 = vst.msk [vmem:[#allocation2 + $0x28] sm:$0xf] %vm742_vm2, %v782_v60 }
 0x13c   : > { %v801_v19 = vld [vmem:[#allocation2 + $0x24] sm:$0xf] }
 0x13d   : > { %v880_v23 = vsub.f32 %v801_v19, %v879_v18 }
 0x13e   : > { %v800_v1 = vld [vmem:[#allocation2 + $0x20] sm:$0xf] }
 0x13f   : > { %v806_v2 = vsub.f32 %v800_v1, %v805_v36  ;;  %v881_v30 = vadd.f32 1.1920929e-07, %v880_v23 }
 0x140   : > { %v803_v16 = vld [vmem:[#allocation2 + $0x2c] sm:$0xf] }
 0x141   : > { %v833_v13 = vsub.f32 %v803_v16, %v832_v41  ;;  %v813_v25 = vadd.f32 1.1920929e-07, %v806_v2 }
 0x142   : > { %v802_v21 = vld [vmem:[#allocation2 + $0x28] sm:$0xf] }
 0x143   : > { %v861_v20 = vsub.f32 %v802_v21, %v860_v10  ;;  %v840_v29 = vadd.f32 1.1920929e-07, %v833_v13  ;;  %v1130_v34 = vpop.eup %1129 }
 0x144   : > { %v1132_v35 = vpop.eup %1131  ;;  %v816_v38 = vmul.f32 %v1130_v34, %v813_v25 }
 0x145   : > { %v862_v26 = vadd.f32 1.1920929e-07, %v861_v20  ;;  %v843_v43 = vmul.f32 %v1132_v35, %v840_v29  ;;  %v882_v44 = vmul.f32 %v1132_v35, %v881_v30 }
 0x146   : > { %v817_v45 = vmul.f32 %v816_v38, %v816_v38  ;;  %v819_v46 = vmul.f32 2.0, %v816_v38 }
 0x147   : > { %v863_v39 = vmul.f32 %v1130_v34, %v862_v26  ;;  %v844_v49 = vmul.f32 %v843_v43, %v843_v43  ;;  %v846_v50 = vmul.f32 2.0, %v843_v43  ;;  %v883_v51 = vmul.f32 %v882_v44, %v882_v44 }
 0x148   : > { %v885_v52 = vmul.f32 2.0, %v882_v44  ;;  %v818_v53 = vmul.f32 %v817_v45, %v809_v12  ;;  %v820_v54 = vmul.f32 %v819_v46, %v806_v2 }
 0x149   : > { %v864_v47 = vmul.f32 %v863_v39, %v863_v39  ;;  %v866_v48 = vmul.f32 2.0, %v863_v39  ;;  %v845_v57 = vmul.f32 %v844_v49, %v836_v17  ;;  %v847_v58 = vmul.f32 %v846_v50, %v833_v13 }
 0x14a   : > { %v884_v59 = vmul.f32 %v883_v51, %v836_v17  ;;  %v886_v60 = vmul.f32 %v885_v52, %v880_v23  ;;  %v821_v61 = vsub.f32 %v812_v40, %v820_v54  ;;  %v823_v62 = vadd.f32 1.1920929e-07, %v818_v53 }
 0x14b   : > { %v865_v55 = vmul.f32 %v864_v47, %v809_v12  ;;  %v867_v56 = vmul.f32 %v866_v48, %v861_v20  ;;  %v848_v3 = vsub.f32 %v839_v42, %v847_v58  ;;  %v850_v7 = vadd.f32 1.1920929e-07, %v845_v57 }
 0x14c   : > { %v887_v4 = vsub.f32 %v812_v40, %v886_v60  ;;  %v889_v5 = vadd.f32 1.1920929e-07, %v884_v59  ;;  %v822_v6 = vadd.f32 %v821_v61, %v818_v53  ;;  %1133 = vlog2.f32 %v823_v62 }
 0x14d   : > { %v868_v63 = vsub.f32 %v839_v42, %v867_v56  ;;  %v870_v0 = vadd.f32 1.1920929e-07, %v865_v55  ;;  %v849_v9 = vadd.f32 %v848_v3, %v845_v57  ;;  %1135 = vlog2.f32 %v850_v7 }
 0x14e   : > { %v888_v11 = vadd.f32 %v887_v4, %v884_v59  ;;  %v826_v12 = vadd.f32 1.1920929e-07, %v822_v6 }
 0x14f   : > { %v869_v8 = vadd.f32 %v868_v63, %v865_v55  ;;  %1137 = vlog2.f32 %v870_v0  ;;  %v853_v15 = vadd.f32 1.1920929e-07, %v849_v9 }
 0x150   : > { %1139 = vlog2.f32 %v889_v5  ;;  %v892_v17 = vadd.f32 1.1920929e-07, %v888_v11 }
 0x151   : > { %v873_v14 = vadd.f32 1.1920929e-07, %v869_v8  ;;  %1141 = vlog2.f32 %v826_v12 }
 0x152   : > { %1143 = vlog2.f32 %v853_v15 }
 0x153   : > { %1145 = vlog2.f32 %v873_v14 }
 0x154   : > { %1147 = vlog2.f32 %v892_v17 }
 0x156   : > { %v1134_v31 = vpop.eup %1133 }
 0x157   : > { %v1136_v36 = vpop.eup %1135  ;;  %v825_v1 = vmul.f32 0.6931472, %v1134_v31 }
 0x158   : > { %v852_v41 = vmul.f32 0.6931472, %v1136_v36 }
 0x159   : > { %v1138_v37 = vpop.eup %1137 }
 0x15a   : > { %v1140_v10 = vpop.eup %1139  ;;  %v872_v16 = vmul.f32 0.6931472, %v1138_v37 }
 0x15b   : > { %v1142_v21 = vpop.eup %1141  ;;  %v891_v22 = vmul.f32 0.6931472, %v1140_v10 }
 0x15c   : > { %v1144_v18 = vpop.eup %1143  ;;  %v828_v19 = vmul.f32 0.6931472, %v1142_v21 }
 0x15d   : > { %v1146_v2 = vpop.eup %1145  ;;  %v855_v20 = vmul.f32 0.6931472, %v1144_v18 }
 0x15e   : > { %v1148_v13 = vpop.eup %1147  ;;  %v829_v24 = vsub.f32 %v825_v1, %v828_v19  ;;  %v875_v23 = vmul.f32 0.6931472, %v1146_v2 }
 0x15f   : > { %v856_v25 = vsub.f32 %v852_v41, %v855_v20  ;;  %v894_v26 = vmul.f32 0.6931472, %v1148_v13 }
 0x160   : > { %v830_v27 = vmul.f32 4.3429446, %v829_v24  ;;  %v876_v28 = vsub.f32 %v872_v16, %v875_v23 }
 0x161   : > { %v857_v29 = vmul.f32 4.3429446, %v856_v25  ;;  %v895_v30 = vsub.f32 %v891_v22, %v894_v26 }
 0x162   : > { %v877_v33 = vmul.f32 4.3429446, %v876_v28 }
 0x163   : > { %v858_v32 = vadd.f32 %v857_v29, %v830_v27  ;;  %v896_v34 = vmul.f32 4.3429446, %v895_v30 }
 0x165   : > { %v897_v35 = vadd.f32 %v896_v34, %v877_v33 }
 0x167   : > { %v898_v38 = vmax.f32 %v858_v32, %v897_v35 }
 0x169   : > { %v899_v39 = vsub.f32 0.0, %v898_v38 }
 0x16b   : > { %900 = vst.msk [vmem:[%s1710_s3] sm:$0xf] %vm742_vm2, %v899_v39 }
 0x16c PF: > { %s19_s17 = sadd.s32 1, %s1293_s17   ;;  %s1721_s12 = smov %s1277_s13 }
 0x16d   : > { %p16_p1 = scmp.ge.s32.totalorder %s19_s17, 6   ;;  %s1722_s13 = smov %s1281_s14 }
 0x16e   : > { %s1723_s14 = smov %s1371_s23  ;;  %s1724_s15 = smov %s1289_s16 }
 0x16f   : > { %s1725_s16 = smov %s1727_s19  ;;  %18 = sbr.rel (!%p16_p1) target bundleno = 6 (0x6), region = 122 }
 0x176   :  { %920 = vsyncpa [#allocation4], 1 }
 0x177   :  { %922 = vsyncpa [#allocation4 + $0x1], 1 }
 0x178   :  { %923 = vsyncpa [#allocation6], 1 }
 0x179   :  { %925 = vsyncpa [#allocation6 + $0x1], 1 }

</bundles_post_ra>
